<compile_context>
chip_gen: v7x
topology: tpu7x:2x2x1
jax: 0.10.0
libtpu: 0.0.40
codegen_flags: <defaults>
</compile_context>

<pallas_src>
import math

import jax
import jax.numpy as jnp
from jax.experimental import pallas as pl
from jax.experimental.pallas import tpu as pltpu


def _biasfree_layernorm_kernel(x_ref, w_ref, o_ref):
    # x_ref/o_ref: (tile_rows, C), w_ref: (1, C)
    x = x_ref[...].astype(jnp.float32)
    w = w_ref[...].astype(jnp.float32)

    inv_c = 1.0 / x.shape[-1]
    # Two-pass statistics: mu, then mean of centered squares (numerically
    # robust when |mean| >> std; extra VPU/XLU work hides under the DMA).
    mu = jnp.sum(x, axis=-1, keepdims=True) * inv_c
    xc = x - mu
    var = jnp.sum(xc * xc, axis=-1, keepdims=True) * inv_c

    inv_sigma = jax.lax.rsqrt(var + 1e-5)
    # NOTE: numerator is x (NOT x - mu) — matches BiasFree_LayerNorm exactly.
    o_ref[...] = (x * inv_sigma * w).astype(o_ref.dtype)


def _round_up(a, b):
    return (a + b - 1) // b * b


def _vmem_capacity_bytes():
    try:
        return int(pltpu.get_tpu_info().vmem_capacity_bytes)
    except Exception:
        return 64 << 20  # conservative default (v7x per-TensorCore VMEM)


@jax.jit
def biasfree_layernorm(x, weight):
    """x: (..., C) array. weight: (C,) scale. Returns same shape/dtype as x."""
    orig_shape = x.shape
    C = orig_shape[-1]
    rows = math.prod(orig_shape[:-1])
    itemsize = jnp.dtype(x.dtype).itemsize

    # ---- tile selection (all static under jit) ------------------------------
    gran = max(8, 32 // itemsize)           # sublane granule: 8 f32 / 16 bf16 / 32 i8
    tile_cap = 64 * gran                    # ~512 f32-rows: HBM roofline plateau
    vmem_cap = _vmem_capacity_bytes()
    budget = min(24 << 20, vmem_cap // 4)   # budget for the 2x(in) + 2x(out) buffers
    fit = budget // (4 * C * max(itemsize, 4))   # f32 temporaries dominate in-kernel
    fit = max(gran, (fit // gran) * gran)

    # Aim for >= ~8 grid steps (megacore + pipelining), never above the caps.
    tile = _round_up(pl.cdiv(rows, 8), gran)
    tile = min(tile, tile_cap, fit)
    if tile >= rows:
        tile = rows                          # single block == full dim (always legal)
    grid = pl.cdiv(rows, tile)

    # No padding: a ragged last block (if any) is handled by Pallas — OOB
    # input rows are unspecified but only feed their own dropped output rows.
    x2d = x.reshape(rows, C)
    w2d = weight.reshape(1, C)

    tile_bytes = tile * C * max(itemsize, 4)
    vmem_limit = int(min(max(8 * tile_bytes + (2 << 20), 16 << 20),
                         vmem_cap // 2, 48 << 20))

    # TODO(synk): consider pipeline_mode=pl.Buffered(3) on the x spec if a
    # profile shows exposed DMA with these short per-step transfers.
    # TODO(synk): a lane-dense (C, rows) presentation for C < 128 would remove
    # masked vst.msk stores, but it needs either a wrapper transpose (3x HBM
    # traffic for this pure streaming op) or MXU segment reductions over a
    # regrouped (rows/G, G*C) view; both lose at the HBM roofline here, so the
    # natural row-major layout is kept.
    out2d = pl.pallas_call(
        _biasfree_layernorm_kernel,
        out_shape=jax.ShapeDtypeStruct((rows, C), x.dtype),
        grid_spec=pltpu.PrefetchScalarGridSpec(
            num_scalar_prefetch=0,
            grid=(grid,),
            in_specs=[
                pl.BlockSpec((tile, C), lambda i: (i, 0)),   # x row tile
                pl.BlockSpec((1, C), lambda i: (0, 0)),      # weight (block-resident)
            ],
            out_specs=pl.BlockSpec((tile, C), lambda i: (i, 0)),
        ),
        compiler_params=pltpu.CompilerParams(
            dimension_semantics=("parallel",),   # rows shard across v7x's 2 TCs
            vmem_limit_bytes=vmem_limit,
        ),
    )(x2d, w2d)

    return out2d.reshape(orig_shape)


def _reference(x, weight):
    x32 = x.astype(jnp.float32)
    var = jnp.var(x32, axis=-1, keepdims=True)  # biased (unbiased=False)
    return (x32 / jnp.sqrt(var + 1e-5) * weight.astype(jnp.float32)).astype(x.dtype)


if __name__ == "__main__":
    key = jax.random.PRNGKey(0)

    # Case 1: typical (B, H*W, C) token layout; rows divide the tile evenly.
    B, H, W, C = 2, 8, 8, 32
    x = jax.random.normal(key, (B, H * W, C), dtype=jnp.float32)
    weight = jnp.ones((C,), dtype=jnp.float32)   # nn.Parameter(torch.ones(C))

    out = biasfree_layernorm(x, weight)
    jax.block_until_ready(out)
    ref = _reference(x, weight)
    assert out.shape == x.shape and out.dtype == x.dtype
    assert jnp.max(jnp.abs(out - ref)) < 2e-5

    # Case 2: awkward row count (126 rows -> ragged last block), offset-heavy
    # data (exercises the two-pass variance) and a non-trivial weight.
    key2, key3 = jax.random.split(jax.random.PRNGKey(1))
    B2, H2, W2, C2 = 2, 7, 9, 48
    x2 = jax.random.normal(key2, (B2, H2 * W2, C2), dtype=jnp.float32) * 3.0 + 10.0
    w2 = jax.random.normal(key3, (C2,), dtype=jnp.float32)

    out2 = biasfree_layernorm(x2, w2)
    jax.block_until_ready(out2)
    ref2 = _reference(x2, w2)
    assert out2.shape == x2.shape and out2.dtype == x2.dtype
    assert jnp.max(jnp.abs(out2 - ref2)) < 5e-5

    print("KERNEL_OK")
</pallas_src>

<mosaic_0001>
module attributes {stable_mosaic.version = 11 : i64} {
  func.func @_biasfree_layernorm_kernel(%arg0: i32, %arg1: memref<16x32xf32, #tpu.memory_space<vmem>>, %arg2: memref<1x32xf32, #tpu.memory_space<vmem>>, %arg3: memref<16x32xf32, #tpu.memory_space<vmem>>) attributes {dimension_semantics = [#tpu.dimension_semantics<parallel>], iteration_bounds = array<i64: 8>, scalar_prefetch = 0 : i64, scratch_operands = 0 : i64, tpu.core_type = #tpu.core_type<tc>, window_params = [{transform_indices = @transform_0, window_bounds = array<i64: 16, 32>}, {pipeline_mode = #tpu.pipeline_mode<synchronous>, transform_indices = @transform_1, window_bounds = array<i64: 1, 32>}, {transform_indices = @transform_2, window_bounds = array<i64: 16, 32>}]} {
    %c0 = arith.constant 0 : index
    %c0_0 = arith.constant 0 : index
    %0 = vector.load %arg1[%c0, %c0_0] : memref<16x32xf32, #tpu.memory_space<vmem>>, vector<16x32xf32>
    %c0_1 = arith.constant 0 : index
    %c0_2 = arith.constant 0 : index
    %1 = vector.load %arg2[%c0_1, %c0_2] : memref<1x32xf32, #tpu.memory_space<vmem>>, vector<1x32xf32>
    %cst = arith.constant dense<0.000000e+00> : vector<16xf32>
    %2 = vector.multi_reduction <add>, %0, %cst [1] : vector<16x32xf32> to vector<16xf32>
    %3 = vector.shape_cast %2 : vector<16xf32> to vector<16x1xf32>
    %cst_3 = arith.constant 3.125000e-02 : f32
    %4 = vector.broadcast %cst_3 : f32 to vector<16x1xf32>
    %5 = arith.mulf %3, %4 : vector<16x1xf32>
    %6 = vector.broadcast %5 : vector<16x1xf32> to vector<16x32xf32>
    %7 = arith.subf %0, %6 : vector<16x32xf32>
    %8 = arith.mulf %7, %7 : vector<16x32xf32>
    %cst_4 = arith.constant dense<0.000000e+00> : vector<16xf32>
    %9 = vector.multi_reduction <add>, %8, %cst_4 [1] : vector<16x32xf32> to vector<16xf32>
    %10 = vector.shape_cast %9 : vector<16xf32> to vector<16x1xf32>
    %cst_5 = arith.constant 3.125000e-02 : f32
    %11 = vector.broadcast %cst_5 : f32 to vector<16x1xf32>
    %12 = arith.mulf %10, %11 : vector<16x1xf32>
    %cst_6 = arith.constant 9.99999974E-6 : f32
    %13 = vector.broadcast %cst_6 : f32 to vector<16x1xf32>
    %14 = arith.addf %12, %13 : vector<16x1xf32>
    %15 = math.rsqrt %14 : vector<16x1xf32>
    %16 = vector.broadcast %15 : vector<16x1xf32> to vector<16x32xf32>
    %17 = arith.mulf %0, %16 : vector<16x32xf32>
    %18 = vector.broadcast %1 : vector<1x32xf32> to vector<16x32xf32>
    %19 = arith.mulf %17, %18 : vector<16x32xf32>
    %c0_7 = arith.constant 0 : index
    %c0_8 = arith.constant 0 : index
    %20 = vector.load %arg3[%c0_7, %c0_8] : memref<16x32xf32, #tpu.memory_space<vmem>>, vector<16x32xf32>
    tpu.vector_store %arg3[%c0_7, %c0_8], %19 {strides = array<i32>} : memref<16x32xf32, #tpu.memory_space<vmem>>, vector<16x32xf32>,
    return
  }
  func.func @transform_0(%arg0: i32) -> (i32, i32) {
    %c0_i32 = arith.constant 0 : i32
    %c0_i32_0 = arith.constant 0 : i32
    return %arg0, %c0_i32 : i32, i32
  }
  func.func @transform_1(%arg0: i32) -> (i32, i32) {
    %c0_i32 = arith.constant 0 : i32
    %c0_i32_0 = arith.constant 0 : i32
    %c0_i32_1 = arith.constant 0 : i32
    return %c0_i32, %c0_i32_0 : i32, i32
  }
  func.func @transform_2(%arg0: i32) -> (i32, i32) {
    %c0_i32 = arith.constant 0 : i32
    %c0_i32_0 = arith.constant 0 : i32
    return %arg0, %c0_i32 : i32, i32
  }
}

</mosaic_0001>

<bundles_post_ra>
// kernel: biasfree_layernorm.1
= control target key start
LH: loop header
LB: loop body
LE: loop exit
PB: predicated region body
PF: predicated region fallthrough
CT: control target
= control target key end

     0   :  { %s290_s9 = smov 0   ;;  %s323_s0 = inlined_call_operand.vmem [shape: f32[128,32], index: 0, kind: input, shape index: {}]   ;;  %s324_s1 = inlined_call_operand.vmem [shape: f32[1,32], index: 1, kind: input, shape index: {}]   ;;  %s325_s2 = inlined_call_operand.vmem [shape: f32[128,32], index: 2, kind: output, shape index: {}]  }
   0x1 LB: > { %s243_s10 = sadd.s32 4294967295, %s273_s9   ;;  %p247_p0 = scmp.ge.s32.totalorder %s273_s9, 1  ;;  %s273_s9 = sphi %s290_s9, %s12_s9  }
   0x2   : > { %p113_p1 = scmp.lt.s32.totalorder %s273_s9, 9 }
   0x4   : > { %p114_p2 = pnand %p247_p0, %p113_p1 }
   0x5   : > { %s248_s11 = sshll.u32 (!%p114_p2), %s243_s10, 1  ;;  %vm150_vm0 = vcmask (!%p114_p2), 261120   ;;  %v252_v21 = vld [vmem:[%s324_s1] ss:$0 sm:$0xff] (!%p114_p2) }
   0x6   : > { %117 = sbr.rel (%p114_p2) target bundleno = 333 (0x14d), region = 28  ;;  %p136_p3 = scmp.lt.s32.totalorder (!%p114_p2), %s248_s11, 15 }
   0xd   : > { %s327_s11 = smov (!%p136_p3, %s248_s11), 15 }
   0xe   : > { %s249_s12 = sshll.u32 %s327_s11, 3 }
   0xf   : > { %s139_s15 = scalar_lea.vmem %s323_s0, %s249_s12  ;;  %s145_s20 = scalar_lea.vmem %s325_s2, %s249_s12 }
  0x10   : > { %v147_v0 = vld [vmem:[%s139_s15] sm:$0xff]  ;;  %v148_v1 = vld [vmem:[%s139_s15 + $0x8] sm:$0xff] }
  0x11   : > { %v151_v2 = vsel %vm150_vm0, %v147_v0, 0.0  ;;  %v154_v3 = vsel %vm150_vm0, %v148_v1, 0.0 }
  0x12   : > { %152 = vadd.xlane.f32.xlu0 %v151_v2 }
  0x16   : > { %155 = vadd.xlane.f32.xlu0 %v154_v3 }
  0x9f   : > { %v153_v4 = vpop.xlane.xlu0 %152 }
  0xa0   : > { %v157_v5 = vmul.f32 0.03125, %v153_v4 }
  0xa2   : > { %v159_v6 = vsub.f32 %v147_v0, %v157_v5 }
  0xa3   : > { %v156_v7 = vpop.xlane.xlu0 %155 }
  0xa4   : > { %v158_v8 = vmul.f32 0.03125, %v156_v7  ;;  %v161_v9 = vmul.f32 %v159_v6, %v159_v6 }
  0xa6   : > { %v160_v10 = vsub.f32 %v148_v1, %v158_v8  ;;  %v163_v11 = vsel %vm150_vm0, %v161_v9, 0.0 }
  0xa7   : > { %164 = vadd.xlane.f32.xlu1 %v163_v11 }
  0xa8   : > { %v162_v12 = vmul.f32 %v160_v10, %v160_v10 }
  0xaa   : > { %v166_v13 = vsel %vm150_vm0, %v162_v12, 0.0 }
  0xab   : > { %167 = vadd.xlane.f32.xlu1 %v166_v13 }
 0x134   : > { %v165_v14 = vpop.xlane.xlu1 %164 }
 0x135   : > { %v169_v15 = vmul.f32 0.03125, %v165_v14 }
 0x137   : > { %v171_v16 = vadd.f32 1e-05, %v169_v15 }
 0x138   : > { %v168_v17 = vpop.xlane.xlu1 %167 }
 0x139   : > { %263 = vrsqrt.f32 %v171_v16  ;;  %v170_v18 = vmul.f32 0.03125, %v168_v17 }
 0x13b   : > { %v172_v19 = vadd.f32 1e-05, %v170_v18 }
 0x13d   : > { %265 = vrsqrt.f32 %v172_v19 }
 0x143   : > { %v264_v20 = vpop.eup %263 }
 0x144   : > { %v175_v22 = vmul.f32 %v264_v20, %v147_v0 }
 0x146   : > { %v183_v23 = vmul.f32 %v252_v21, %v175_v22 }
 0x147   : > { %v266_v24 = vpop.eup %265 }
 0x148   : > { %185 = vst.msk [vmem:[%s145_s20] sm:$0xff] %vm150_vm0, %v183_v23  ;;  %v176_v25 = vmul.f32 %v266_v24, %v148_v1 }
 0x14a   : > { %v184_v26 = vmul.f32 %v252_v21, %v176_v25 }
 0x14c   : > { %186 = vst.msk [vmem:[%s145_s20 + $0x8] sm:$0xff] %vm150_vm0, %v184_v26 }
 0x14d PF: > { %s12_s9 = sadd.s32 1, %s273_s9  }
 0x14e   : > { %p9_p4 = scmp.ge.s32.totalorder %s12_s9, 10  }
 0x150   :  { %11 = sbr.rel (!%p9_p4) target bundleno = 1 (0x1), region = 58 }

</bundles_post_ra>
